<compile_context>
chip_gen: v5e
topology: v5e:2x2
jax: 0.10.0
libtpu: 0.0.40
codegen_flags: <defaults>
</compile_context>

<pallas_src>
import jax
import jax.numpy as jnp
import numpy as np
from jax.experimental import pallas as pl
from jax.experimental.pallas import tpu as pltpu


def _mixed_op_kernel(fa_ref, fb_ref, sa_ref, sb_ref, bias_ref,
                     ops_a_ref, ops_b_ref, out_ref):
    """grid = (r, k): r tiles rows ("parallel"), k iterates gate PAIRS."""
    k = pl.program_id(1)

    @pl.when(k == 0)
    def _init():
        # Sum of all non-positive weights, broadcast once into the output tile.
        out_ref[...] = jnp.full(out_ref.shape, bias_ref[0], dtype=out_ref.dtype)

    sa = sa_ref[k]  # weight of gate slot 2k (0.0 if dead / padded)

    @pl.when(sa > 0.0)
    def _acc_a():
        out_ref[...] += sa * ops_a_ref[...].astype(out_ref.dtype)

    sb = sb_ref[k]  # weight of gate slot 2k+1 (0.0 if dead / padded)

    @pl.when(sb > 0.0)
    def _acc_b():
        out_ref[...] += sb * ops_b_ref[...].astype(out_ref.dtype)


def mixed_op_shared(h_op_stack, weights, original_id, *,
                    tile_bytes=4 * 1024 * 1024,
                    vmem_budget_bytes=40 * 1024 * 1024):
    """
    h_op_stack : [K, num_nodes, N, C, H, W]  outputs of each shared primitive
                 for every node id (any float dtype; bf16 stays bf16 in HBM).
    weights    : [K] architecture weights.
    original_id: python int, node id selected by this MixedOpShared instance.
    returns    : [N, C, H, W] float32.
    """
    K, num_nodes, N, C, H, W = h_op_stack.shape
    oid = int(original_id)
    assert 0 <= oid < num_nodes
    total = N * C * H * W

    # ---- lane-dense view of the op stack ------------------------------------
    pad = (-total) % 128
    if pad:
        # Rare path: pad only the selected node's [K, total] slab (one small
        # copy), not the whole [K, num_nodes, total] stack.
        total_p = total + pad
        flat = jnp.pad(h_op_stack[:, oid].reshape(K, total), ((0, 0), (0, pad)))
        flat = flat.reshape(K, 1, total_p)
        eff_oid = 0
    else:
        total_p = total
        flat = h_op_stack.reshape(K, num_nodes, total)   # bitcast reshape
        eff_oid = oid

    # Lane width: largest divisor of total_p among {1024..128} that also keeps
    # R a multiple of 8 (so tiles are not mostly sublane padding); fall back to
    # the smallest divisor otherwise.
    cands = [c for c in (1024, 512, 256, 128) if total_p % c == 0]
    LW = next((c for c in cands if (total_p // c) % 8 == 0), cands[-1])
    R = total_p // LW
    ops4 = flat.reshape(flat.shape[0], flat.shape[1], R, LW)  # bitcast reshape

    in_item = jnp.dtype(h_op_stack.dtype).itemsize

    # ---- tile sizing against the full resident VMEM footprint ---------------
    # Resident VMEM ~= 2 input streams x 2 bufs (input dtype) + 2 output bufs (f32).
    per_row_bytes = LW * (2 * 2 * in_item + 2 * 4)
    # Rows per tile from the per-input-tile target.
    TR = max(8, (tile_bytes // (LW * in_item)) // 8 * 8)
    # Keep >= 2 row tiles whenever R allows, so the "parallel" r axis actually
    # shards across v7x's two TensorCores.
    if R >= 16:
        TR = min(TR, max(8, (R // 2) // 8 * 8))
    # Cap by the total VMEM budget.
    TR = min(TR, max(8, (vmem_budget_bytes // per_row_bytes) // 8 * 8))
    TR = min(TR, R)
    # Prefer a TR that divides R (no ragged edge tile) if one exists nearby.
    for t in range(TR, 7, -8):
        if R % t == 0:
            if 2 * t >= TR:
                TR = t
            break
    num_r = pl.cdiv(R, TR)

    est_vmem = TR * per_row_bytes
    vmem_limit = int(min(max(est_vmem * 2, 32 * 1024 * 1024), 56 * 1024 * 1024))

    # ---- gate preprocessing (K-element ops, negligible) ----------------------
    wf = weights.astype(jnp.float32).reshape(K)
    active = wf > 0.0
    n_act = jnp.sum(active.astype(jnp.int32))
    # Active gates first (stable), dead gates after.
    order = jnp.argsort(jnp.where(active, 0, 1)).astype(jnp.int32)

    k_steps = (K + 1) // 2
    ka = jnp.arange(k_steps, dtype=jnp.int32)

    # Stream A serves even gate slots (2k), stream B serves odd slots (2k+1).
    # Dead slots in each stream repeat that stream's last ACTIVE slot so the
    # pipeline sees a constant block index and can elide the HBM re-fetch.
    last_a = jnp.maximum(((n_act - 1) // 2) * 2, 0)
    last_b = jnp.where(n_act >= 2, ((n_act - 2) // 2) * 2 + 1,
                       jnp.minimum(1, K - 1))
    slot_a = jnp.minimum(2 * ka, last_a)
    slot_b = jnp.minimum(2 * ka + 1, last_b)
    fetch_a = order[slot_a].astype(jnp.int32)
    fetch_b = order[slot_b].astype(jnp.int32)
    scale_a = jnp.where(2 * ka < n_act,
                        wf[order[jnp.minimum(2 * ka, K - 1)]], 0.0
                        ).astype(jnp.float32)
    scale_b = jnp.where(2 * ka + 1 < n_act,
                        wf[order[jnp.minimum(2 * ka + 1, K - 1)]], 0.0
                        ).astype(jnp.float32)
    bias = jnp.sum(jnp.where(active, 0.0, wf)).reshape(1).astype(jnp.float32)

    grid_spec = pltpu.PrefetchScalarGridSpec(
        num_scalar_prefetch=5,            # fetch_a, fetch_b, scale_a, scale_b, bias
        grid=(num_r, k_steps),            # R outer (parallel), gate pairs inner
        in_specs=[
            pl.BlockSpec((None, None, TR, LW),
                         lambda r, k, fa, fb, sa, sb, b: (fa[k], eff_oid, r, 0)),
            pl.BlockSpec((None, None, TR, LW),
                         lambda r, k, fa, fb, sa, sb, b: (fb[k], eff_oid, r, 0)),
        ],
        out_specs=pl.BlockSpec((TR, LW),
                               lambda r, k, fa, fb, sa, sb, b: (r, 0)),
    )

    cost = pl.CostEstimate(
        flops=2 * K * total_p,
        transcendentals=0,
        bytes_accessed=K * total_p * in_item + total_p * 4,
    )

    out2d = pl.pallas_call(
        _mixed_op_kernel,
        grid_spec=grid_spec,
        out_shape=jax.ShapeDtypeStruct((R, LW), jnp.float32),
        compiler_params=pltpu.CompilerParams(
            dimension_semantics=("parallel", "arbitrary"),
            vmem_limit_bytes=vmem_limit),
        cost_estimate=cost,
    )(fetch_a, fetch_b, scale_a, scale_b, bias, ops4, ops4)

    return out2d.reshape(total_p)[:total].reshape(N, C, H, W)


def _reference(h_op_stack, weights, original_id):
    """Pure-JAX replica of the PyTorch forward for correctness checking."""
    ops = h_op_stack[:, original_id]
    out = jnp.zeros(ops.shape[1:], dtype=jnp.float32)
    for i in range(weights.shape[0]):
        w = weights[i].astype(jnp.float32)
        out = out + jnp.where(w > 0.0, w * ops[i].astype(jnp.float32), w)
    return out


if __name__ == "__main__":
    key = jax.random.PRNGKey(0)
    k_ops, k_w = jax.random.split(key)

    # Small shapes consistent with the module's usage:
    K = 7            # number of primitives (len(PRIMITIVES))
    num_nodes = 3    # op[...] is indexed by original_id
    N, C, H, W = 2, 4, 16, 16
    original_id = 1

    h_op_stack = jax.random.normal(
        k_ops, (K, num_nodes, N, C, H, W), dtype=jnp.float32)
    # Mix of positive / non-positive weights to exercise both branches.
    weights = jax.random.normal(k_w, (K,), dtype=jnp.float32)

    out = jax.block_until_ready(mixed_op_shared(h_op_stack, weights, original_id))
    ref = jax.block_until_ready(_reference(h_op_stack, weights, original_id))

    assert out.shape == (N, C, H, W)
    np.testing.assert_allclose(np.asarray(out), np.asarray(ref),
                               rtol=1e-5, atol=1e-5)
    print("KERNEL_OK")
</pallas_src>

<mosaic_0001>
module attributes {stable_mosaic.version = 11 : i64} {
  func.func @_mixed_op_kernel(%arg0: i32, %arg1: i32, %arg2: memref<4xi32, #tpu.memory_space<smem>>, %arg3: memref<4xi32, #tpu.memory_space<smem>>, %arg4: memref<4xf32, #tpu.memory_space<smem>>, %arg5: memref<4xf32, #tpu.memory_space<smem>>, %arg6: memref<1xf32, #tpu.memory_space<smem>>, %arg7: memref<1x1x8x256xf32, #tpu.memory_space<vmem>>, %arg8: memref<1x1x8x256xf32, #tpu.memory_space<vmem>>, %arg9: memref<8x256xf32, #tpu.memory_space<vmem>>) attributes {dimension_semantics = [#tpu.dimension_semantics<parallel>, #tpu.dimension_semantics<arbitrary>], iteration_bounds = array<i64: 1, 4>, scalar_prefetch = 5 : i64, scratch_operands = 0 : i64, tpu.core_type = #tpu.core_type<tc>, window_params = [{transform_indices = @transform_0, window_bounds = array<i64: 1, 1, 8, 256>}, {transform_indices = @transform_1, window_bounds = array<i64: 1, 1, 8, 256>}, {transform_indices = @transform_2, window_bounds = array<i64: 8, 256>}]} {
    %c0_i32 = arith.constant 0 : i32
    %0 = arith.cmpi eq, %arg1, %c0_i32 : i32
    %1 = arith.extui %0 : i1 to i32
    %c0_i32_0 = arith.constant 0 : i32
    %2 = arith.cmpi ne, %1, %c0_i32_0 : i32
    scf.if %2 {
      %c0 = arith.constant 0 : index
      %13 = memref.load %arg6[%c0] : memref<1xf32, #tpu.memory_space<smem>>
      %14 = vector.broadcast %13 : f32 to vector<8x256xf32>
      %c0_4 = arith.constant 0 : index
      %c0_5 = arith.constant 0 : index
      %15 = vector.load %arg9[%c0_4, %c0_5] : memref<8x256xf32, #tpu.memory_space<vmem>>, vector<8x256xf32>
      tpu.vector_store %arg9[%c0_4, %c0_5], %14 {strides = array<i32>} : memref<8x256xf32, #tpu.memory_space<vmem>>, vector<8x256xf32>,
    } else {
    }
    %3 = arith.index_cast %arg1 : i32 to index
    %4 = memref.load %arg4[%3] : memref<4xf32, #tpu.memory_space<smem>>
    %cst = arith.constant 0.000000e+00 : f32
    %5 = arith.cmpf ogt, %4, %cst : f32
    %6 = arith.extui %5 : i1 to i32
    %c0_i32_1 = arith.constant 0 : i32
    %7 = arith.cmpi ne, %6, %c0_i32_1 : i32
    scf.if %7 {
      %c0 = arith.constant 0 : index
      %c0_4 = arith.constant 0 : index
      %13 = vector.load %arg9[%c0, %c0_4] : memref<8x256xf32, #tpu.memory_space<vmem>>, vector<8x256xf32>
      %c0_5 = arith.constant 0 : index
      %c0_6 = arith.constant 0 : index
      %c0_7 = arith.constant 0 : index
      %c0_8 = arith.constant 0 : index
      %14 = vector.load %arg7[%c0_5, %c0_6, %c0_7, %c0_8] : memref<1x1x8x256xf32, #tpu.memory_space<vmem>>, vector<1x1x8x256xf32>
      %15 = vector.shape_cast %14 : vector<1x1x8x256xf32> to vector<8x256xf32>
      %16 = vector.broadcast %4 : f32 to vector<8x256xf32>
      %17 = arith.mulf %16, %15 : vector<8x256xf32>
      %18 = arith.addf %13, %17 : vector<8x256xf32>
      %c0_9 = arith.constant 0 : index
      %c0_10 = arith.constant 0 : index
      %19 = vector.load %arg9[%c0_9, %c0_10] : memref<8x256xf32, #tpu.memory_space<vmem>>, vector<8x256xf32>
      tpu.vector_store %arg9[%c0_9, %c0_10], %18 {strides = array<i32>} : memref<8x256xf32, #tpu.memory_space<vmem>>, vector<8x256xf32>,
    } else {
    }
    %8 = arith.index_cast %arg1 : i32 to index
    %9 = memref.load %arg5[%8] : memref<4xf32, #tpu.memory_space<smem>>
    %cst_2 = arith.constant 0.000000e+00 : f32
    %10 = arith.cmpf ogt, %9, %cst_2 : f32
    %11 = arith.extui %10 : i1 to i32
    %c0_i32_3 = arith.constant 0 : i32
    %12 = arith.cmpi ne, %11, %c0_i32_3 : i32
    scf.if %12 {
      %c0 = arith.constant 0 : index
      %c0_4 = arith.constant 0 : index
      %13 = vector.load %arg9[%c0, %c0_4] : memref<8x256xf32, #tpu.memory_space<vmem>>, vector<8x256xf32>
      %c0_5 = arith.constant 0 : index
      %c0_6 = arith.constant 0 : index
      %c0_7 = arith.constant 0 : index
      %c0_8 = arith.constant 0 : index
      %14 = vector.load %arg8[%c0_5, %c0_6, %c0_7, %c0_8] : memref<1x1x8x256xf32, #tpu.memory_space<vmem>>, vector<1x1x8x256xf32>
      %15 = vector.shape_cast %14 : vector<1x1x8x256xf32> to vector<8x256xf32>
      %16 = vector.broadcast %9 : f32 to vector<8x256xf32>
      %17 = arith.mulf %16, %15 : vector<8x256xf32>
      %18 = arith.addf %13, %17 : vector<8x256xf32>
      %c0_9 = arith.constant 0 : index
      %c0_10 = arith.constant 0 : index
      %19 = vector.load %arg9[%c0_9, %c0_10] : memref<8x256xf32, #tpu.memory_space<vmem>>, vector<8x256xf32>
      tpu.vector_store %arg9[%c0_9, %c0_10], %18 {strides = array<i32>} : memref<8x256xf32, #tpu.memory_space<vmem>>, vector<8x256xf32>,
    } else {
    }
    return
  }
  func.func @transform_0(%arg0: i32, %arg1: i32, %arg2: memref<4xi32, #tpu.memory_space<smem>>, %arg3: memref<4xi32, #tpu.memory_space<smem>>, %arg4: memref<4xf32, #tpu.memory_space<smem>>, %arg5: memref<4xf32, #tpu.memory_space<smem>>, %arg6: memref<1xf32, #tpu.memory_space<smem>>) -> (i32, i32, i32, i32) {
    %0 = arith.index_cast %arg1 : i32 to index
    %1 = memref.load %arg2[%0] : memref<4xi32, #tpu.memory_space<smem>>
    %c1_i32 = arith.constant 1 : i32
    %c0_i32 = arith.constant 0 : i32
    %c0_i32_0 = arith.constant 0 : i32
    return %1, %c1_i32, %arg0, %c0_i32 : i32, i32, i32, i32
  }
  func.func @transform_1(%arg0: i32, %arg1: i32, %arg2: memref<4xi32, #tpu.memory_space<smem>>, %arg3: memref<4xi32, #tpu.memory_space<smem>>, %arg4: memref<4xf32, #tpu.memory_space<smem>>, %arg5: memref<4xf32, #tpu.memory_space<smem>>, %arg6: memref<1xf32, #tpu.memory_space<smem>>) -> (i32, i32, i32, i32) {
    %0 = arith.index_cast %arg1 : i32 to index
    %1 = memref.load %arg3[%0] : memref<4xi32, #tpu.memory_space<smem>>
    %c1_i32 = arith.constant 1 : i32
    %c0_i32 = arith.constant 0 : i32
    %c0_i32_0 = arith.constant 0 : i32
    return %1, %c1_i32, %arg0, %c0_i32 : i32, i32, i32, i32
  }
  func.func @transform_2(%arg0: i32, %arg1: i32, %arg2: memref<4xi32, #tpu.memory_space<smem>>, %arg3: memref<4xi32, #tpu.memory_space<smem>>, %arg4: memref<4xf32, #tpu.memory_space<smem>>, %arg5: memref<4xf32, #tpu.memory_space<smem>>, %arg6: memref<1xf32, #tpu.memory_space<smem>>) -> (i32, i32) {
    %c0_i32 = arith.constant 0 : i32
    %c0_i32_0 = arith.constant 0 : i32
    return %arg0, %c0_i32 : i32, i32
  }
}

</mosaic_0001>

<bundles_post_ra>
// kernel: tpu_custom_call.1
= control target key start
LH: loop header
LB: loop body
LE: loop exit
PB: predicated region body
PF: predicated region fallthrough
CT: control target
= control target key end

     0   :  { %s738_s30 = smov [#allocation3]   ;;  %s739_s8 = smov [#allocation4]   ;;  %s1031_s0 = inlined_call_operand.vmem [shape: s32[4], index: 0, kind: input, shape index: {}]   ;;  %s1032_s5 = inlined_call_operand.hbm [shape: f32[7,3,8,256], index: 5, kind: input, shape index: {}]   ;;  %s1033_s6 = inlined_call_operand.hbm [shape: f32[7,3,8,256], index: 6, kind: input, shape index: {}]   ;;  %s1034_s7 = inlined_call_operand.hbm [shape: f32[8,256], index: 7, kind: output, shape index: {}]   ;;  %s1035_s1 = inlined_call_operand.vmem [shape: s32[4], index: 1, kind: input, shape index: {}]   ;;  %s1036_s2 = inlined_call_operand.vmem [shape: f32[4], index: 2, kind: input, shape index: {}]   ;;  %s1037_s3 = inlined_call_operand.vmem [shape: f32[4], index: 3, kind: input, shape index: {}]   ;;  %s1038_s4 = inlined_call_operand.<no memory space> [shape: f32[1], index: 4, kind: input, shape index: {}]  }
   0x1   :  { %1042 = sst [smem:[#allocation23_spill]] %s1032_s5  ;;  %s13_s26 = sshll.u32 %s1031_s0, 4  ;;  %s14_s26 = int_to_ptr.vmem [resolvable:$true] %s13_s26 }
   0x2   :  { %s18_s29 = sshll.u32 %s1035_s1, 4  ;;  %s23_s11 = sshll.u32 %s1036_s2, 4  ;;  %s19_s29 = int_to_ptr.vmem [resolvable:$true] %s18_s29  ;;  %s24_s11 = int_to_ptr.vmem [resolvable:$true] %s23_s11 }
   0x3   :  { %16 = dma.vmem_to_smem %s14_s26, 16, %s738_s30, [#allocation2] }
   0x4   :  { %21 = dma.vmem_to_smem %s19_s29, 16, %s739_s8, [#allocation2] }
   0x5   :  { %s28_s14 = sshll.u32 %s1037_s3, 4  ;;  %s740_s0 = smov [#allocation5]   ;;  %s29_s14 = int_to_ptr.vmem [resolvable:$true] %s28_s14 }
   0x6   :  { %26 = dma.vmem_to_smem %s24_s11, 16, %s740_s0, [#allocation2] }
   0x7   :  { %s741_s15 = smov [#allocation6]   ;;  %32 = sst [smem:[#allocation7]] %s1038_s4 }
   0x8   :  { %31 = dma.vmem_to_smem %s29_s14, 16, %s741_s15, [#allocation2] }
   0x9   :  { %688 = dma.done.wait [#allocation2], 64 }
   0xa   :  { %689 = vsyncadd [#allocation2], 4294967232 }
   0xb   :  { %35 = sfence }
   0xc   :  { %36 = vsyncpa [#allocation9], 0 }
   0xd   :  { %38 = vsyncpa [#allocation9 + $0x1], 0 }
   0xe   :  { %39 = vsyncpa [#allocation12], 0 }
   0xf   :  { %41 = vsyncpa [#allocation12 + $0x1], 0 }
  0x10   :  { %42 = vsyncpa [#allocation10], 0  ;;  %s798_s2 = smov 0   ;;  %s800_s3 = smov 0  }
  0x11   :  { %s802_s17 = smov 0   ;;  %s804_s18 = smov 0  }
  0x12   :  { %s806_s19 = smov 0   ;;  %s808_s20 = smov 0  }
  0x13   :  { %s810_s4 = smov 0   ;;  %s812_s21 = smov 0  }
  0x14   :  { %s814_s22 = smov 0  }
  0x15 LB: > { %s57_s23 = sadd.s32 1, %s732_s21  ;;  %s1039_s24 = sadd.s32 4294967295, %s736_s22   ;;  %s736_s22 = sphi %s814_s22, %s48_s22   ;;  %s732_s21 = sphi %s812_s21, %s1066_s21   ;;  %s728_s4 = sphi %s810_s4, %s1065_s4   ;;  %s724_s20 = sphi %s808_s20, %s1064_s20   ;;  %s720_s19 = sphi %s806_s19, %s1063_s19   ;;  %s716_s18 = sphi %s804_s18, %s1062_s18   ;;  %s712_s17 = sphi %s802_s17, %s1061_s17   ;;  %s708_s3 = sphi %s800_s3, %s1060_s3   ;;  %s704_s2 = sphi %s798_s2, %s1059_s2  }
  0x16   : > { %p58_p0 = scmp.ge.s32.totalorder %s57_s23, 4  ;;  %s64_s25 = sld [smem:[#allocation3 + %s732_s21]] }
  0x17   : > { %p78_p1 = scmp.ne.s32.totalorder %s724_s20, %s720_s19  ;;  %p79_p2 = scmp.eq.s32.totalorder %s736_s22, 0 }
  0x18   : > { %s1068_s23 = smov (%p58_p0, %s57_s23), 0  ;;  %p84_p3 = scmp.ne.s32.totalorder %s720_s19, %s716_s18 }
  0x19   : > { %1043 = sst [smem:[#allocation22_spill]] %s1068_s23  ;;  %p853_p4 = scmp.eq.s32.totalorder %s1039_s24, 0 }
  0x1a   : > { %s65_s26 = sld [smem:[#allocation3 + %s1068_s23]]  ;;  %s71_s28 = sadd.s32 1, %s724_s20 }
  0x1b   : > { %p860_p5 = por %p853_p4, %p84_p3  ;;  %p866_p6 = por %p79_p2, %p78_p1 }
  0x1c   : > { %s164_s8 = sand.u32 1, %s724_s20   ;;  %p1040_p7 = scmp.lt.s32.totalorder %s736_s22, 4 }
  0x1d   : > { %s401_s9 = sshll.u32 %s164_s8, 4  ;;  %s94_s10 = sld [smem:[#allocation4 + %s732_s21]] }
  0x1e   : > { %p879_p8 = pnand %p1040_p7, %p866_p6  ;;  %s168_s13 = scalar_lea.vmem [#allocation8], %s401_s9 }
  0x1f   : > { %s883_s14 = sshll.u32 %s168_s13, 4  ;;  %p405_p10 = scmp.ge.s32.totalorder %s736_s22, 1  ;;  %s182_s14 = int_to_ptr.vmem [resolvable:$true] %s883_s14 }
  0x20   : > { %s66_s11 = ssub.s32 %s64_s25, %s65_s26  ;;  %p210_p11 = scmp.lt.s32.totalorder %s736_s22, 5 }
  0x21   : > { %p69_p9 = scmp.eq.s32.totalorder %s66_s11, 0  ;;  %s95_s25 = sld [smem:[#allocation4 + %s1068_s23]] }
  0x22   : > { %s413_s0 = scalar_select %p866_p6, [#allocation3], [#allocation14] }
  0x23   : > { %s888_s15 = scalar_select %p69_p9, %s724_s20, %s71_s28  }
  0x24   : > { %s414_s1 = scalar_select %p866_p6, %s732_s21, 0 }
  0x25   : > { %s1070_s0 = smov (!%p1040_p7, %s413_s0), [#allocation16]  ;;  %p899_p12 = pnand %p405_p10, %p210_p11 }
  0x26   : > { %s1072_s1 = smov (!%p1040_p7, %s414_s1), 0  ;;  %p108_p13 = scmp.ne.s32.totalorder %s712_s17, %s708_s3 }
  0x27   : > { %s169_s16 = sld [smem:[%s1070_s0 + %s1072_s1]]  ;;  %p114_p0 = scmp.ne.s32.totalorder %s708_s3, %s704_s2 }
  0x28   : > { %s101_s28 = sadd.s32 1, %s712_s17  ;;  %s1049_s5 = sld [smem:[#allocation23_spill]] }
  0x29   : > { %p915_p1 = por %p114_p0, %p853_p4  ;;  %p921_p3 = por %p108_p13, %p79_p2 }
  0x2a   : > { %s96_s2 = ssub.s32 %s94_s10, %s95_s25  ;;  %p568_p9 = pneg %p879_p8 }
  0x2b   : > { %p925_p6 = scmp.eq.s32.totalorder %s96_s2, 0 }
  0x2d   : > { %s402_s26 = smul.u32 48, %s169_s16 }
  0x2f   : > { %s335_s11 = scalar_lea.hbm %s1049_s5, %s402_s26  ;;  %s165_s26 = scalar_lea.sflag [#allocation9], %s164_s8 }
  0x30   : > { %s336_s0 = scalar_lea.hbm %s335_s11, 16 }
  0x31   : > { %s179_s16 = sshll.u32 %s336_s0, 4  ;;  %s571_s0 = scalar_lea.hbm %s1049_s5, 336  ;;  %s180_s16 = int_to_ptr.hbm [resolvable:$true] %s179_s16 }
  0x32   : > { %s564_s27 = sshra.s32 %s180_s16, 4  ;;  %s565_s27 = int_to_ptr.hbm [resolvable:$true] %s564_s27 }
  0x33   : > { %s566_s30 = scalar_lea.hbm %s565_s27, 16  ;;  %p572_p11 = scmp.lt.s32.totalorder %s565_s27, %s1049_s5 }
  0x34   : > { %p567_p4 = scmp.ne.s32.totalorder %s565_s27, %s566_s30  ;;  %p573_p13 = scmp.lt.s32.totalorder %s571_s0, %s566_s30 }
  0x36   : > { %p569_p10 = pnand %p568_p9, %p567_p4  ;;  %p574_p0 = por %p573_p13, %p572_p11 }
  0x38   : > { %p570_p2 = pneg %p569_p10 }
  0x3a   : > { %p575_p7 = pnand %p574_p0, %p570_p2 }
  0x3c   : > { %578 = shalt.err (!%p575_p7)
}
  0x3d   : > { %430 = dma.hbm_to_vmem [thread:$0]  (!%p879_p8), %s180_s16, 256, %s182_s14, %s165_s26  }
  0x3e   : > { %s944_s8 = scalar_select %p925_p6, %s712_s17, %s101_s28  }
  0x3f   : > { %s188_s2 = sand.u32 1, %s712_s17   ;;  %p1053_p4 = scmp.lt.s32.totalorder %s736_s22, 4 }
  0x40   : > { %s416_s12 = scalar_select %p921_p3, [#allocation4], [#allocation15] }
  0x41   : > { %p951_p7 = pnand %p1053_p4, %p921_p3  ;;  %p1055_p9 = pmov %p1053_p4 }
  0x42   : > { %s417_s30 = scalar_select %p921_p3, %s732_s21, 0 }
  0x43   : > { %s1074_s12 = smov (!%p1055_p9, %s416_s12), [#allocation17]  ;;  %p1056_p10 = pmov %p1053_p4 }
  0x44   : > { %s403_s14 = sshll.u32 %s188_s2, 4  ;;  %s189_s1 = scalar_lea.sflag [#allocation12], %s188_s2 }
  0x45   : > { %s1076_s30 = smov (!%p1056_p10, %s417_s30), 0  ;;  %s192_s16 = scalar_lea.vmem [#allocation11], %s403_s14 }
  0x46   : > { %s193_s24 = sld [smem:[%s1074_s12 + %s1076_s30]]  ;;  %s205_s26 = sshll.u32 %s192_s16, 4  ;;  %s206_s26 = int_to_ptr.vmem [resolvable:$true] %s205_s26 }
  0x47   : > { %p598_p3 = pneg %p951_p7  ;;  %s601_s14 = scalar_lea.hbm %s1033_s6, 336 }
  0x4c   : > { %s404_s28 = smul.u32 48, %s193_s24 }
  0x4e   : > { %s344_s0 = scalar_lea.hbm %s1033_s6, %s404_s28 }
  0x4f   : > { %s345_s10 = scalar_lea.hbm %s344_s0, 16 }
  0x50   : > { %s203_s25 = sshll.u32 %s345_s10, 4  ;;  %s204_s25 = int_to_ptr.hbm [resolvable:$true] %s203_s25 }
  0x51   : > { %s594_s5 = sshra.s32 %s204_s25, 4  ;;  %s595_s5 = int_to_ptr.hbm [resolvable:$true] %s594_s5 }
  0x52   : > { %s596_s23 = scalar_lea.hbm %s595_s5, 16  ;;  %p602_p11 = scmp.lt.s32.totalorder %s595_s5, %s1033_s6 }
  0x53   : > { %p597_p8 = scmp.ne.s32.totalorder %s595_s5, %s596_s23  ;;  %p603_p13 = scmp.lt.s32.totalorder %s601_s14, %s596_s23 }
  0x55   : > { %p599_p6 = pnand %p598_p3, %p597_p8  ;;  %p604_p0 = por %p603_p13, %p602_p11 }
  0x57   : > { %p600_p2 = pneg %p599_p6 }
  0x59   : > { %p605_p4 = pnand %p604_p0, %p600_p2 }
  0x5b   : > { %608 = shalt.err (!%p605_p4)
}
  0x5c   : > { %435 = dma.hbm_to_vmem [thread:$0]  (!%p951_p7), %s204_s25, 256, %s206_s26, %s189_s1  }
  0x5d   : > { %214 = sbr.rel (%p899_p12) target bundleno = 149 (0x95), region = 28  ;;  %s216_s2 = sand.u32 (!%p899_p12), 1, %s720_s19  }
  0x5e   : > { %s406_s28 = sshll.u32 (!%p899_p12), %s216_s2, 4  ;;  %s217_s9 = scalar_lea.sflag (!%p899_p12), [#allocation9], %s216_s2 }
  0x5f   : > { %s220_s11 = scalar_lea.vmem (!%p899_p12), [#allocation8], %s406_s28 }
  0x62   : > { %691 = dma.done.wait (%p860_p5), %s217_s9, 256  }
  0x63   : > { %693 = vsyncadd (%p860_p5), %s217_s9, 4294967040  ;;  %s226_s5 = sand.u32 1, %s708_s3  }
  0x64   : > { %s985_s23 = sshll.u32 %s226_s5, 4  ;;  %s227_s27 = scalar_lea.sflag [#allocation12], %s226_s5 }
  0x65   : > { %s230_s18 = scalar_lea.vmem [#allocation11], %s985_s23 }
  0x66   : > { %695 = dma.done.wait (%p915_p1), %s227_s27, 256  }
  0x67   : > { %697 = vsyncadd (%p915_p1), %s227_s27, 4294967040  ;;  %p408_p12 = scmp.ne.s32.totalorder %s728_s4, 0 }
  0x68   : > { %s258_s26 = sld [smem:[#allocation7]] (!%p408_p12) }
  0x69   : > { %257 = sbr.rel (%p408_p12) target bundleno = 113 (0x71), region = 40 }
  0x6e   : > { %v259_v0 = vstv %s258_s26 }
  0x6f   : > { %260 = vst [vmem:[#allocation13] sm:$0xff] %v259_v0 }
  0x70   : > { %261 = vst [vmem:[#allocation13 + $0x8] sm:$0xff] %v259_v0 }
  0x71 PF: > { %s262_s29 = sld [smem:[#allocation5 + %s728_s4]] }
  0x77   : > { %p263_p5 = scmp.gt.f32.partialorder %s262_s29, 0.0 }
  0x78   : > { %v267_v1 = vld [vmem:[#allocation13] sm:$0xff] (%p263_p5)  ;;  %v271_v3 = vstv (%p263_p5), %s262_s29  ;;  %v268_v5 = vld [vmem:[#allocation13 + $0x8] sm:$0xff] (%p263_p5) }
  0x79   : > { %266 = sbr.rel (!%p263_p5) target bundleno = 128 (0x80), region = 44  ;;  %v269_v2 = vld [vmem:[%s220_s11] sm:$0xff] (%p263_p5)  ;;  %v270_v6 = vld [vmem:[%s220_s11 + $0x8] sm:$0xff] (%p263_p5) }
  0x7a   : > { %v272_v4 = vmul.f32 (%p263_p5), %v271_v3, %v269_v2  ;;  %v273_v7 = vmul.f32 (%p263_p5), %v271_v3, %v270_v6 }
  0x7c   : > { %v274_v8 = vadd.f32 (%p263_p5), %v272_v4, %v267_v1  ;;  %v275_v9 = vadd.f32 (%p263_p5), %v273_v7, %v268_v5 }
  0x7e   : > { %276 = vst [vmem:[#allocation13] sm:$0xff] %v274_v8 }
  0x7f   : > { %277 = vst [vmem:[#allocation13 + $0x8] sm:$0xff] %v275_v9 }
  0x80 PF: > { %s278_s13 = sld [smem:[#allocation6 + %s728_s4]] }
  0x86   : > { %p279_p1 = scmp.gt.f32.partialorder %s278_s13, 0.0 }
  0x87   : > { %v283_v10 = vld [vmem:[#allocation13] sm:$0xff] (%p279_p1)  ;;  %v287_v12 = vstv (%p279_p1), %s278_s13  ;;  %v284_v14 = vld [vmem:[#allocation13 + $0x8] sm:$0xff] (%p279_p1) }
  0x88   : > { %282 = sbr.rel (!%p279_p1) target bundleno = 143 (0x8f), region = 48  ;;  %v285_v11 = vld [vmem:[%s230_s18] sm:$0xff] (%p279_p1)  ;;  %v286_v15 = vld [vmem:[%s230_s18 + $0x8] sm:$0xff] (%p279_p1) }
  0x89   : > { %v288_v13 = vmul.f32 (%p279_p1), %v287_v12, %v285_v11  ;;  %v289_v16 = vmul.f32 (%p279_p1), %v287_v12, %v286_v15 }
  0x8b   : > { %v290_v17 = vadd.f32 (%p279_p1), %v288_v13, %v283_v10  ;;  %v291_v18 = vadd.f32 (%p279_p1), %v289_v16, %v284_v14 }
  0x8d   : > { %292 = vst [vmem:[#allocation13] sm:$0xff] %v290_v17 }
  0x8e   : > { %293 = vst [vmem:[#allocation13 + $0x8] sm:$0xff] %v291_v18 }
  0x8f PF: > { %s1057_s4 = sadd.s32 4294967295, %s736_s22   ;;  %s305_s25 = sshll.u32 %s1034_s7, 4  ;;  %s306_s25 = int_to_ptr.hbm [resolvable:$true] %s305_s25 }
  0x90   : > { %p437_p7 = scmp.eq.s32.totalorder %s1057_s4, 3  ;;  %s742_s1 = smov [#allocation13]  }
  0x91   : > { %s303_s12 = sshll.u32 %s742_s1, 4  ;;  %s304_s12 = int_to_ptr.vmem [resolvable:$true] %s303_s12 }
  0x92   : > { %422 = dma.vmem_to_hbm [thread:$0]  (%p437_p7), %s304_s12, 256, %s306_s25, [#allocation10]  }
  0x93   : > { %699 = dma.done.wait (%p437_p7), [#allocation10], 256  }
  0x94   : > { %701 = vsyncadd (%p437_p7), [#allocation10], 4294967040 }
  0x95 PF: > { %s48_s22 = sadd.s32 1, %s736_s22   ;;  %s1058_s30 = sld [smem:[#allocation22_spill]] }
  0x96   : > { %p45_p9 = scmp.ge.s32.totalorder %s48_s22, 6   ;;  %s1059_s2 = smov %s708_s3 }
  0x97   : > { %s1060_s3 = smov %s712_s17  ;;  %s1061_s17 = smov %s944_s8 }
  0x98   : > { %s1062_s18 = smov %s720_s19  ;;  %s1063_s19 = smov %s724_s20 }
  0x99   : > { %s1064_s20 = smov %s888_s15  ;;  %s1065_s4 = smov %s732_s21 }
  0x9a   :  { %47 = sbr.rel (!%p45_p9) target bundleno = 21 (0x15), region = 91 }
  0x9b   : > { %s1066_s21 = smov %s1058_s30 }
  0x9f   :  { %319 = vsyncpa [#allocation9], 1 }
  0xa0   :  { %321 = vsyncpa [#allocation9 + $0x1], 1 }
  0xa1   :  { %322 = vsyncpa [#allocation12], 1 }
  0xa2   :  { %324 = vsyncpa [#allocation12 + $0x1], 1 }
  0xa3   :  { %325 = vsyncpa [#allocation10], 1 }
  0xa4   :  { %327 = vsyncpa [#allocation10 + $0x1], 1 }

</bundles_post_ra>
